<compile_context>
chip_gen: v7x
topology: tpu7x:2x2x1
jax: 0.10.0
libtpu: 0.0.40
codegen_flags: <defaults>
</compile_context>

<pallas_src>
import functools

import jax
import jax.numpy as jnp
from jax.experimental import pallas as pl
from jax.experimental.pallas import tpu as pltpu

LANES = 128
CHUNK_ROWS = 512          # in-kernel sub-chunk: keeps f32 temporaries tiny
TILE_BYTES = 4 << 20      # ~4 MiB of VMEM per input per pipeline buffer


def _round_up(x, m):
    return ((x + m - 1) // m) * m


def _cdiv(a, b):
    return -(-a // b)


def _tensorcores_per_chip():
    # v7x has 2 TensorCores per chip (a "parallel" grid axis genuinely shards);
    # v5e / v6e have 1, where an extra split is pure overhead.
    try:
        kind = jax.devices()[0].device_kind.lower()
    except Exception:
        return 1
    return 2 if "v7" in kind else 1


def _mse_kernel(pred_ref, label_ref, out_ref, acc_ref, *,
                tile_rows, chunk_rows, tiles_per_split, total_tiles,
                total_rows):
    c = pl.program_id(0)          # parallel split (TensorCore shard on v7x)
    i = pl.program_id(1)          # sequential reduction step within the split

    @pl.when(i == 0)
    def _():
        acc_ref[...] = jnp.zeros_like(acc_ref)

    t = c * tiles_per_split + i   # logical tile index
    n_chunks = tile_rows // chunk_rows

    def tile_partial(masked):
        # Stream the tile in small sub-chunks (static unroll) so the f32
        # temporaries stay at a few vregs' worth of VMEM even for multi-MiB
        # tiles; the running sum is one full (8, 128) vreg of partials.
        acc = jnp.zeros((8, LANES), jnp.float32)
        for j in range(n_chunks):
            r0 = j * chunk_rows
            a = pred_ref[pl.ds(r0, chunk_rows), :].astype(jnp.float32)
            b = label_ref[pl.ds(r0, chunk_rows), :].astype(jnp.float32)
            d = a - b
            if masked:
                row_ids = (t * tile_rows + r0
                           + jax.lax.broadcasted_iota(
                               jnp.int32, (chunk_rows, LANES), 0))
                d = jnp.where(row_ids < total_rows, d, 0.0)
            acc = acc + jnp.sum(
                (d * d).reshape(chunk_rows // 8, 8, LANES), axis=0)
        return acc

    # Hot path: interior tiles never need masking -> pure streaming VPU work
    # hidden under the input DMA.
    @pl.when(t < total_tiles - 1)
    def _():
        acc_ref[...] += tile_partial(masked=False)

    # Cold path: last logical tile (possibly ragged) and any clamped over-run
    # step of the parallel split -> rows past the array end are zeroed.
    @pl.when(t >= total_tiles - 1)
    def _():
        acc_ref[...] += tile_partial(masked=True)

    @pl.when(i == pl.num_programs(1) - 1)
    def _():
        out_ref[...] = acc_ref[...].reshape(1, 8, LANES)


def mse_loss(prediction, label, *, force_pallas=False, tile_rows=None,
             num_splits=None):
    """Pallas equivalent of torch.square(prediction - label).mean() (f32)."""
    assert prediction.shape == label.shape, (prediction.shape, label.shape)
    n = int(prediction.size)
    if n == 0:
        return jnp.float32(jnp.nan)   # torch: mean of an empty tensor is NaN

    pred_flat = jnp.ravel(prediction)
    label_flat = jnp.ravel(label)

    itemsize = max(jnp.dtype(prediction.dtype).itemsize,
                   jnp.dtype(label.dtype).itemsize)
    # ~4 MiB per input per pipeline buffer, dtype aware (8192 rows f32, 16384 bf16).
    default_tile_rows = max(CHUNK_ROWS, TILE_BYTES // (LANES * itemsize))

    rows = n // LANES
    rem = n - rows * LANES

    # Small inputs (<= ~2 tiles) can't amortize launch + pipeline prologue;
    # XLA's fused reduction is already at the roofline there.
    if rows == 0 or (not force_pallas and rows <= 2 * default_tile_rows):
        d = pred_flat.astype(jnp.float32) - label_flat.astype(jnp.float32)
        return jnp.sum(d * d) / n

    # The kernel streams the 128-aligned prefix as a [rows, 128] slab in its
    # NATIVE dtype; the <=127-element ragged tail is folded in with plain jnp
    # (no jnp.pad full-array copies for ragged sizes).
    if rem:
        aligned = rows * LANES
        pred2d = pred_flat[:aligned].reshape(rows, LANES)
        label2d = label_flat[:aligned].reshape(rows, LANES)
        d_tail = (pred_flat[aligned:].astype(jnp.float32)
                  - label_flat[aligned:].astype(jnp.float32))
        tail_sq = jnp.sum(d_tail * d_tail)
    else:
        pred2d = pred_flat.reshape(rows, LANES)
        label2d = label_flat.reshape(rows, LANES)
        tail_sq = jnp.float32(0.0)

    # --- Tile sizing (dtype aware; tile is a multiple of the in-kernel chunk).
    desired = int(tile_rows) if tile_rows is not None else default_tile_rows
    desired = max(8, min(desired, _round_up(rows, 8)))
    chunk = CHUNK_ROWS if desired >= CHUNK_ROWS else _round_up(desired, 8)
    tile = _round_up(desired, chunk)
    total_tiles = _cdiv(rows, tile)

    # --- Parallel split across TensorCores (2 only on v7x by default). ------
    if num_splits is None:
        num_splits = 2 if (_tensorcores_per_chip() >= 2 and total_tiles >= 4) else 1
    num_splits = max(1, min(int(num_splits), total_tiles))

    if num_splits == 2 and total_tiles % 2:
        # Try to even out the tile count so both TensorCores do equal work and
        # the clamped duplicate step (one wasted tile DMA) disappears.
        cand = _round_up(_cdiv(rows, total_tiles + 1), chunk)
        if _cdiv(rows, cand) % 2 == 0:
            tile = cand
            total_tiles = _cdiv(rows, cand)
    tiles_per_split = _cdiv(total_tiles, num_splits)

    def in_map(c, i):
        # Clamp so the DMA window never starts past the array end; over-run
        # rows are masked to zero inside the kernel.
        return (jnp.minimum(c * tiles_per_split + i, total_tiles - 1), 0)

    kernel = functools.partial(
        _mse_kernel,
        tile_rows=tile,
        chunk_rows=chunk,
        tiles_per_split=tiles_per_split,
        total_tiles=total_tiles,
        total_rows=rows,
    )

    partials = pl.pallas_call(
        kernel,
        out_shape=jax.ShapeDtypeStruct((num_splits, 8, LANES), jnp.float32),
        grid_spec=pltpu.PrefetchScalarGridSpec(
            num_scalar_prefetch=0,
            grid=(num_splits, tiles_per_split),
            in_specs=[
                pl.BlockSpec((tile, LANES), in_map),
                pl.BlockSpec((tile, LANES), in_map),
            ],
            out_specs=pl.BlockSpec((1, 8, LANES), lambda c, i: (c, 0, 0)),
            scratch_shapes=[pltpu.VMEM((8, LANES), jnp.float32)],
        ),
        compiler_params=pltpu.CompilerParams(
            dimension_semantics=("parallel", "arbitrary"),
            # 2 inputs x 2 pipeline buffers x ~4 MiB = ~16 MiB: past v5e's
            # 16 MiB scoped default, well inside v7x's 64 MiB physical VMEM.
            vmem_limit_bytes=32 << 20,
        ),
    )(pred2d, label2d)

    # Tiny final combine: cross-lane/sublane + cross-split reduce of the
    # num_splits x 8 x 128 partials plus the ragged tail, over the TRUE count.
    return (jnp.sum(partials) + tail_sq) / n


def _ref_mse(p, l):
    return jnp.mean(jnp.square(p.astype(jnp.float32) - l.astype(jnp.float32)))


if __name__ == "__main__":
    key = jax.random.PRNGKey(0)
    k1, k2, k3, k4, k5, k6 = jax.random.split(key, 6)

    # Primary example: recommender-style score tensor (batch=2, items=4, 16x16).
    shape = (2, 4, 16, 16)
    pred = jax.random.normal(k1, shape, dtype=jnp.float32)
    label = jax.random.normal(k2, shape, dtype=jnp.float32)
    ref = _ref_mse(pred, label)

    out_small = jax.block_until_ready(mse_loss(pred, label))            # jnp bypass
    out_pallas = jax.block_until_ready(mse_loss(pred, label, force_pallas=True))
    assert jnp.allclose(out_small, ref, rtol=1e-5, atol=1e-6), (out_small, ref)
    assert jnp.allclose(out_pallas, ref, rtol=1e-5, atol=1e-6), (out_pallas, ref)

    # Multi-tile sweep, ragged last tile + forced 2-way split (exercises the
    # clamped, fully-masked over-run step on every TPU generation).
    p2 = jax.random.normal(k3, (2100, 128), dtype=jnp.float32)
    l2 = jax.random.normal(k4, (2100, 128), dtype=jnp.float32)
    out2 = jax.block_until_ready(
        mse_loss(p2, l2, force_pallas=True, tile_rows=512, num_splits=2))
    assert jnp.allclose(out2, _ref_mse(p2, l2), rtol=1e-4, atol=1e-6), out2

    # bf16 inputs + lane tail (n % 128 != 0): native-dtype streaming, the tail
    # is folded in outside the kernel.
    p3 = jax.random.normal(k5, (410, 130), dtype=jnp.bfloat16)
    l3 = jax.random.normal(k6, (410, 130), dtype=jnp.bfloat16)
    out3 = jax.block_until_ready(
        mse_loss(p3, l3, force_pallas=True, tile_rows=128))
    assert jnp.allclose(out3, _ref_mse(p3, l3), rtol=1e-3, atol=1e-5), out3

    print("KERNEL_OK")
</pallas_src>

<mosaic_0001>
module attributes {stable_mosaic.version = 11 : i64} {
  func.func @_mse_kernel(%arg0: i32, %arg1: i32, %arg2: memref<16x128xf32, #tpu.memory_space<vmem>>, %arg3: memref<16x128xf32, #tpu.memory_space<vmem>>, %arg4: memref<1x8x128xf32, #tpu.memory_space<vmem>>, %arg5: memref<8x128xf32, #tpu.memory_space<vmem>>) attributes {dimension_semantics = [#tpu.dimension_semantics<parallel>, #tpu.dimension_semantics<arbitrary>], iteration_bounds = array<i64: 1, 1>, scalar_prefetch = 0 : i64, scratch_operands = 1 : i64, tpu.core_type = #tpu.core_type<tc>, window_params = [{transform_indices = @transform_0, window_bounds = array<i64: 16, 128>}, {transform_indices = @transform_1, window_bounds = array<i64: 16, 128>}, {transform_indices = @transform_2, window_bounds = array<i64: 1, 8, 128>}]} {
    %c0_i32 = arith.constant 0 : i32
    %0 = arith.cmpi eq, %arg1, %c0_i32 : i32
    %1 = arith.extui %0 : i1 to i32
    %c0_i32_0 = arith.constant 0 : i32
    %2 = arith.cmpi ne, %1, %c0_i32_0 : i32
    scf.if %2 {
      %cst = arith.constant 0.000000e+00 : f32
      %14 = vector.broadcast %cst : f32 to vector<8x128xf32>
      %c0 = arith.constant 0 : index
      %c0_7 = arith.constant 0 : index
      %15 = vector.load %arg5[%c0, %c0_7] : memref<8x128xf32, #tpu.memory_space<vmem>>, vector<8x128xf32>
      tpu.vector_store %arg5[%c0, %c0_7], %14 {strides = array<i32>} : memref<8x128xf32, #tpu.memory_space<vmem>>, vector<8x128xf32>,
    } else {
    }
    %c1_i32 = arith.constant 1 : i32
    %3 = arith.muli %arg0, %c1_i32 : i32
    %4 = arith.addi %3, %arg1 : i32
    %c0_i32_1 = arith.constant 0 : i32
    %5 = arith.cmpi slt, %4, %c0_i32_1 : i32
    %6 = arith.extui %5 : i1 to i32
    %c0_i32_2 = arith.constant 0 : i32
    %7 = arith.cmpi ne, %6, %c0_i32_2 : i32
    scf.if %7 {
      %c0 = arith.constant 0 : index
      %c0_7 = arith.constant 0 : index
      %14 = vector.load %arg5[%c0, %c0_7] : memref<8x128xf32, #tpu.memory_space<vmem>>, vector<8x128xf32>
      %cst = arith.constant 0.000000e+00 : f32
      %15 = vector.broadcast %cst : f32 to vector<8x128xf32>
      %c0_8 = arith.constant 0 : index
      %c0_9 = arith.constant 0 : index
      %16 = vector.load %arg2[%c0_8, %c0_9] : memref<16x128xf32, #tpu.memory_space<vmem>>, vector<16x128xf32>
      %c0_10 = arith.constant 0 : index
      %c0_11 = arith.constant 0 : index
      %17 = vector.load %arg3[%c0_10, %c0_11] : memref<16x128xf32, #tpu.memory_space<vmem>>, vector<16x128xf32>
      %18 = arith.subf %16, %17 : vector<16x128xf32>
      %19 = arith.mulf %18, %18 : vector<16x128xf32>
      %20 = vector.shape_cast %19 : vector<16x128xf32> to vector<2x8x128xf32>
      %cst_12 = arith.constant dense<0.000000e+00> : vector<8x128xf32>
      %21 = vector.multi_reduction <add>, %20, %cst_12 [0] : vector<2x8x128xf32> to vector<8x128xf32>
      %22 = arith.addf %15, %21 : vector<8x128xf32>
      %23 = arith.addf %14, %22 : vector<8x128xf32>
      %c0_13 = arith.constant 0 : index
      %c0_14 = arith.constant 0 : index
      %24 = vector.load %arg5[%c0_13, %c0_14] : memref<8x128xf32, #tpu.memory_space<vmem>>, vector<8x128xf32>
      tpu.vector_store %arg5[%c0_13, %c0_14], %23 {strides = array<i32>} : memref<8x128xf32, #tpu.memory_space<vmem>>, vector<8x128xf32>,
    } else {
    }
    %c0_i32_3 = arith.constant 0 : i32
    %8 = arith.cmpi sge, %4, %c0_i32_3 : i32
    %9 = arith.extui %8 : i1 to i32
    %c0_i32_4 = arith.constant 0 : i32
    %10 = arith.cmpi ne, %9, %c0_i32_4 : i32
    scf.if %10 {
      %c0 = arith.constant 0 : index
      %c0_7 = arith.constant 0 : index
      %14 = vector.load %arg5[%c0, %c0_7] : memref<8x128xf32, #tpu.memory_space<vmem>>, vector<8x128xf32>
      %cst = arith.constant 0.000000e+00 : f32
      %15 = vector.broadcast %cst : f32 to vector<8x128xf32>
      %c0_8 = arith.constant 0 : index
      %c0_9 = arith.constant 0 : index
      %16 = vector.load %arg2[%c0_8, %c0_9] : memref<16x128xf32, #tpu.memory_space<vmem>>, vector<16x128xf32>
      %c0_10 = arith.constant 0 : index
      %c0_11 = arith.constant 0 : index
      %17 = vector.load %arg3[%c0_10, %c0_11] : memref<16x128xf32, #tpu.memory_space<vmem>>, vector<16x128xf32>
      %18 = arith.subf %16, %17 : vector<16x128xf32>
      %c16_i32 = arith.constant 16 : i32
      %19 = arith.muli %4, %c16_i32 : i32
      %c0_i32_12 = arith.constant 0 : i32
      %20 = arith.addi %19, %c0_i32_12 : i32
      %21 = tpu.iota {dimensions = array<i32: 0>} : vector<16x128xi32>
      %22 = vector.broadcast %20 : i32 to vector<16x128xi32>
      %23 = arith.addi %22, %21 : vector<16x128xi32>
      %c16_i32_13 = arith.constant 16 : i32
      %24 = vector.broadcast %c16_i32_13 : i32 to vector<16x128xi32>
      %25 = arith.cmpi slt, %23, %24 : vector<16x128xi32>
      %cst_14 = arith.constant 0.000000e+00 : f32
      %26 = vector.broadcast %cst_14 : f32 to vector<16x128xf32>
      %27 = arith.select %25, %18, %26 : vector<16x128xi1>, vector<16x128xf32>
      %28 = arith.mulf %27, %27 : vector<16x128xf32>
      %29 = vector.shape_cast %28 : vector<16x128xf32> to vector<2x8x128xf32>
      %cst_15 = arith.constant dense<0.000000e+00> : vector<8x128xf32>
      %30 = vector.multi_reduction <add>, %29, %cst_15 [0] : vector<2x8x128xf32> to vector<8x128xf32>
      %31 = arith.addf %15, %30 : vector<8x128xf32>
      %32 = arith.addf %14, %31 : vector<8x128xf32>
      %c0_16 = arith.constant 0 : index
      %c0_17 = arith.constant 0 : index
      %33 = vector.load %arg5[%c0_16, %c0_17] : memref<8x128xf32, #tpu.memory_space<vmem>>, vector<8x128xf32>
      tpu.vector_store %arg5[%c0_16, %c0_17], %32 {strides = array<i32>} : memref<8x128xf32, #tpu.memory_space<vmem>>, vector<8x128xf32>,
    } else {
    }
    %c0_i32_5 = arith.constant 0 : i32
    %11 = arith.cmpi eq, %arg1, %c0_i32_5 : i32
    %12 = arith.extui %11 : i1 to i32
    %c0_i32_6 = arith.constant 0 : i32
    %13 = arith.cmpi ne, %12, %c0_i32_6 : i32
    scf.if %13 {
      %c0 = arith.constant 0 : index
      %c0_7 = arith.constant 0 : index
      %14 = vector.load %arg5[%c0, %c0_7] : memref<8x128xf32, #tpu.memory_space<vmem>>, vector<8x128xf32>
      %15 = vector.shape_cast %14 : vector<8x128xf32> to vector<1x8x128xf32>
      %c0_8 = arith.constant 0 : index
      %c0_9 = arith.constant 0 : index
      %c0_10 = arith.constant 0 : index
      %16 = vector.load %arg4[%c0_8, %c0_9, %c0_10] : memref<1x8x128xf32, #tpu.memory_space<vmem>>, vector<1x8x128xf32>
      tpu.vector_store %arg4[%c0_8, %c0_9, %c0_10], %15 {strides = array<i32>} : memref<1x8x128xf32, #tpu.memory_space<vmem>>, vector<1x8x128xf32>,
    } else {
    }
    return
  }
  func.func @transform_0(%arg0: i32, %arg1: i32) -> (i32, i32) {
    %c1_i32 = arith.constant 1 : i32
    %0 = arith.muli %arg0, %c1_i32 : i32
    %1 = arith.addi %0, %arg1 : i32
    %c0_i32 = arith.constant 0 : i32
    %2 = arith.minsi %1, %c0_i32 : i32
    %c0_i32_0 = arith.constant 0 : i32
    %c0_i32_1 = arith.constant 0 : i32
    return %2, %c0_i32_0 : i32, i32
  }
  func.func @transform_1(%arg0: i32, %arg1: i32) -> (i32, i32) {
    %c1_i32 = arith.constant 1 : i32
    %0 = arith.muli %arg0, %c1_i32 : i32
    %1 = arith.addi %0, %arg1 : i32
    %c0_i32 = arith.constant 0 : i32
    %2 = arith.minsi %1, %c0_i32 : i32
    %c0_i32_0 = arith.constant 0 : i32
    %c0_i32_1 = arith.constant 0 : i32
    return %2, %c0_i32_0 : i32, i32
  }
  func.func @transform_2(%arg0: i32, %arg1: i32) -> (i32, i32, i32) {
    %c0_i32 = arith.constant 0 : i32
    %c0_i32_0 = arith.constant 0 : i32
    %c0_i32_1 = arith.constant 0 : i32
    return %arg0, %c0_i32, %c0_i32_0 : i32, i32, i32
  }
}

</mosaic_0001>

<bundles_post_ra>
// kernel: tpu_custom_call.1
= control target key start
LH: loop header
LB: loop body
LE: loop exit
PB: predicated region body
PF: predicated region fallthrough
CT: control target
= control target key end

     0   :  { %7 = vsyncpa [#allocation4], 0  ;;  %s269_s0 = inlined_call_operand.hbm [shape: f32[16,128], index: 0, kind: input, shape index: {}]   ;;  %s270_s1 = inlined_call_operand.hbm [shape: f32[16,128], index: 1, kind: input, shape index: {}]   ;;  %s271_s2 = inlined_call_operand.hbm [shape: f32[1,8,128], index: 2, kind: output, shape index: {}]  }
   0x1   :  { %8 = vsyncpa [#allocation7], 0 }
   0x2   :  { %9 = vsyncpa [#allocation5], 0  ;;  %s213_s9 = smov [#allocation3]   ;;  %s141_s13 = scalar_lea.hbm %s269_s0, 256 }
   0x3   :  { %s21_s10 = sshll.u32 %s213_s9, 4  ;;  %p142_p0 = scmp.ne.s32.totalorder %s269_s0, %s141_s13  ;;  %s22_s10 = int_to_ptr.vmem [resolvable:$true] %s21_s10 }
   0x4   :  { %p145_p1 = scmp.lt.u32.totalorder %s141_s13, %s269_s0 }
   0x6   :  { %p147_p2 = pnand %p145_p1, %p142_p0 }
   0x8   :  { %150 = shalt.err (!%p147_p2)
}
   0x9   :  { %s151_s18 = scalar_lea.vmem %s22_s10, 256  ;;  %p156_p4 = scmp.lt.s32.totalorder %s22_s10, %s22_s10 }
   0xa   :  { %p152_p3 = scmp.ne.s32.totalorder %s22_s10, %s151_s18  ;;  %p157_p5 = scmp.lt.s32.totalorder %s151_s18, %s151_s18 }
   0xc   :  { %p158_p6 = por %p157_p5, %p156_p4 }
   0xe   :  { %p159_p7 = pnand %p158_p6, %p152_p3 }
  0x10   :  { %162 = shalt.err (!%p159_p7)
}
  0x11   :  { %s214_s19 = smov 128   ;;  %s215_s20 = smov 8  }
  0x12   :  { %27 = dma.hbm_to_vmem [thread:$0]  %s269_s0, 256, %s22_s10, [#allocation4], %s214_s19, %s214_s19, %s215_s20  }
  0x13   :  { %s216_s23 = smov [#allocation6]   ;;  %s163_s27 = scalar_lea.hbm %s270_s1, 256 }
  0x14   :  { %s39_s24 = sshll.u32 %s216_s23, 4  ;;  %p164_p8 = scmp.ne.s32.totalorder %s270_s1, %s163_s27  ;;  %s40_s24 = int_to_ptr.vmem [resolvable:$true] %s39_s24 }
  0x15   :  { %p167_p9 = scmp.lt.u32.totalorder %s163_s27, %s270_s1 }
  0x17   :  { %p169_p10 = pnand %p167_p9, %p164_p8 }
  0x19   :  { %172 = shalt.err (!%p169_p10)
}
  0x1a   :  { %s173_s4 = scalar_lea.vmem %s40_s24, 256  ;;  %p178_p12 = scmp.lt.s32.totalorder %s40_s24, %s40_s24 }
  0x1b   :  { %p174_p11 = scmp.ne.s32.totalorder %s40_s24, %s173_s4  ;;  %p179_p13 = scmp.lt.s32.totalorder %s173_s4, %s173_s4 }
  0x1d   :  { %p180_p0 = por %p179_p13, %p178_p12 }
  0x1f   :  { %p181_p1 = pnand %p180_p0, %p174_p11 }
  0x21   :  { %184 = shalt.err (!%p181_p1)
}
  0x22   :  { %45 = dma.hbm_to_vmem [thread:$0]  %s270_s1, 256, %s40_s24, [#allocation7], %s214_s19, %s214_s19, %s215_s20  }
  0x23   :  { %207 = dma.done.wait [#allocation4], 256  }
  0x24   :  { %208 = vsyncadd [#allocation4], 4294967040 }
  0x25   :  { %209 = dma.done.wait [#allocation7], 256  }
  0x26   :  { %210 = vsyncadd [#allocation7], 4294967040  ;;  %v88_v0 = vld [vmem:[#allocation3] sm:$0xff]  ;;  %v89_v1 = vld [vmem:[#allocation3 + $0x8] sm:$0xff]  ;;  %s217_s6 = smov [#allocation8]  }
  0x27   :  { %v90_v2 = vld [vmem:[#allocation6] sm:$0xff]  ;;  %v91_v3 = vld [vmem:[#allocation6 + $0x8] sm:$0xff]  ;;  %s122_s7 = sshll.u32 %s217_s6, 4  ;;  %s123_s7 = int_to_ptr.vmem [resolvable:$true] %s122_s7 }
  0x28   :  { %v92_v4 = vsub.f32 %v88_v0, %v90_v2  ;;  %v93_v5 = vsub.f32 %v89_v1, %v91_v3  ;;  %s185_s8 = scalar_lea.vmem %s123_s7, 128  ;;  %p190_p3 = scmp.lt.s32.totalorder %s123_s7, %s123_s7 }
  0x29   :  { %p186_p2 = scmp.ne.s32.totalorder %s123_s7, %s185_s8  ;;  %p191_p4 = scmp.lt.s32.totalorder %s185_s8, %s185_s8 }
  0x2a   :  { %v105_v6 = vmul.f32 %v92_v4, %v92_v4  ;;  %v106_v7 = vmul.f32 %v93_v5, %v93_v5 }
  0x2b   :  { %p192_p5 = por %p191_p4, %p190_p3 }
  0x2c   :  { %v107_v8 = vadd.f32 %v106_v7, %v105_v6 }
  0x2d   :  { %p193_p6 = pnand %p192_p5, %p186_p2 }
  0x2e   :  { %115 = vst [vmem:[#allocation8] sm:$0xff] %v107_v8 }
  0x2f   :  { %196 = shalt.err (!%p193_p6)
}
  0x30   :  { %s197_s10 = scalar_lea.hbm %s271_s2, 128 }
  0x31   :  { %p198_p7 = scmp.ne.s32.totalorder %s271_s2, %s197_s10  ;;  %p201_p8 = scmp.lt.u32.totalorder %s197_s10, %s271_s2 }
  0x33   :  { %p203_p9 = pnand %p201_p8, %p198_p7 }
  0x35   :  { %206 = shalt.err (!%p203_p9)
}
  0x36   :  { %125 = dma.vmem_to_hbm [thread:$0]  %s123_s7, 128, %s271_s2, [#allocation5]  }
  0x37   :  { %211 = dma.done.wait [#allocation5], 128  }
  0x38   :  { %212 = vsyncadd [#allocation5], 4294967168 }
  0x39   :  { %129 = vsyncpa [#allocation4], 1 }
  0x3a   :  { %130 = vsyncpa [#allocation7], 1 }
  0x3b   :  { %131 = vsyncpa [#allocation5], 1 }

</bundles_post_ra>
